<compile_context>
chip_gen: v5e
topology: v5e:2x2
jax: 0.10.0
libtpu: 0.0.40
codegen_flags: <defaults>
</compile_context>

<pallas_src>
import math

import jax
import jax.numpy as jnp
from jax.experimental import pallas as pl
from jax.experimental.pallas import tpu as pltpu


def _round_up(x, m):
    return ((x + m - 1) // m) * m


def _device_kind():
    try:
        return jax.devices()[0].device_kind.lower()
    except Exception:
        return ""


def _make_pooler_kernel(n_chunks, chunk_rows, low_precision_tanh):
    """Kernel over one (tb, H) row tile of token-0 activations.

    The tile is processed in `n_chunks` independent row sub-chunks so the LLO
    scheduler can overlap the MXU matmul of chunk k+1 with the VPU bias-add and
    EUP tanh of chunk k.
    """

    def kernel(x_ref, w_ref, b_ref, out_ref):
        w = w_ref[...]                            # resident (H, H) weight
        b = b_ref[...].astype(jnp.float32)        # (1, H) bias, hoisted
        for c in range(n_chunks):                 # static unroll (<= 4 chunks)
            r0 = c * chunk_rows
            x = x_ref[pl.ds(r0, chunk_rows), :]
            # MXU matmul with f32 accumulation, f32 bias add.
            y = jnp.dot(x, w, preferred_element_type=jnp.float32) + b
            if low_precision_tanh:
                # bf16 EUP tanh (v6e/v7x); output is bf16 anyway.
                y = jnp.tanh(y.astype(out_ref.dtype))
            else:
                y = jnp.tanh(y)
            out_ref[pl.ds(r0, chunk_rows), :] = y.astype(out_ref.dtype)

    return kernel


def bert_pooler(hidden_states, w, b, *, tb_cap=512):
    """hidden_states: (B, S, H); w: (H_in, H_out) (torch weight transposed);
    b: (H,) or (1, H). Returns tanh(hidden_states[:, 0] @ w + b), shape (B, H)."""
    B, S, H = hidden_states.shape
    out_dtype = hidden_states.dtype

    # Keep the MXU on the fast (e.g. bf16) path and cut weight DMA bytes.
    if w.dtype != out_dtype:
        w = w.astype(out_dtype)
    if b.ndim == 1:
        b = b.reshape(1, -1)
    if b.dtype != out_dtype:
        b = b.astype(out_dtype)

    # Fused token-0 gather: feed (B, S*H); the (tb, H) block at column-block 0
    # IS token 0 of each row, so the pipeline DMA does the strided gather.
    fuse_gather = (H % 128 == 0) or (S == 1)
    if fuse_gather:
        x_in = hidden_states.reshape(B, S * H)
    else:
        # Fallback for unaligned toy hidden sizes (would violate the lane-dim
        # divisibility rule): slice in the wrapper.
        x_in = hidden_states[:, 0, :]

    kind = _device_kind()
    two_tc = ("v7" in kind) or ("v4" in kind) or ("v5p" in kind)
    # v5-and-older EUP has no bf16 transcendental path.
    old_eup = any(t in kind for t in ("v2", "v3", "v4", "v5"))
    lp_tanh = (jnp.dtype(out_dtype) == jnp.dtype(jnp.bfloat16)) and not old_eup

    # Row tile: big, lane-dense tiles; on 2-TC chips guarantee >= 2 grid steps
    # so the "parallel" axis actually uses both TensorCores.
    if B <= tb_cap:
        if two_tc and B > 8:
            tb = _round_up(pl.cdiv(B, 2), 8)
        else:
            tb = B
    else:
        tb = tb_cap
    grid = (pl.cdiv(B, tb),)

    # Sub-chunking of the row tile (each chunk must stay sublane-aligned).
    n_chunks = 1
    for n in (4, 2):
        if tb % n == 0 and (tb // n) % 8 == 0:
            n_chunks = n
            break
    chunk_rows = tb // n_chunks

    # VMEM budget from actual dtypes: double-buffered x/out tiles, resident
    # weight (single-buffered when large), bias, slack.
    x_item = jnp.dtype(x_in.dtype).itemsize
    w_item = jnp.dtype(w.dtype).itemsize
    o_item = jnp.dtype(out_dtype).itemsize
    w_bytes = w_item * H * H
    single_buffer_w = w_bytes > (8 << 20)
    w_bufs = 1 if single_buffer_w else 2
    vmem_est = (2 * x_item * tb * H
                + 2 * o_item * tb * H
                + w_bufs * w_bytes
                + 2 * w_item * H
                + (4 << 20))
    vmem_cap = (56 << 20) if ("v7" in kind) else (100 << 20)
    vmem_limit = int(min(max(vmem_est, 16 << 20), vmem_cap))

    def _invariant_spec(shape):
        # Grid-invariant operand: fetched once, kept resident. Single-buffer it
        # when large so 2x H^2 buffers can't exceed v7x's 64 MiB VMEM.
        if single_buffer_w:
            try:
                return pl.BlockSpec(shape, lambda i: (0, 0),
                                    pipeline_mode=pl.Buffered(1))
            except Exception:
                pass
        return pl.BlockSpec(shape, lambda i: (0, 0))

    kernel = _make_pooler_kernel(n_chunks, chunk_rows, lp_tanh)

    return pl.pallas_call(
        kernel,
        out_shape=jax.ShapeDtypeStruct((B, H), out_dtype),
        grid_spec=pltpu.PrefetchScalarGridSpec(
            num_scalar_prefetch=0,
            grid=grid,
            in_specs=[
                pl.BlockSpec((tb, H), lambda i: (i, 0)),  # token-0 rows (fused gather)
                _invariant_spec((H, H)),                   # weight (grid-invariant)
                _invariant_spec((1, H)),                   # bias   (grid-invariant)
            ],
            out_specs=pl.BlockSpec((tb, H), lambda i: (i, 0)),
        ),
        compiler_params=pltpu.CompilerParams(
            dimension_semantics=("parallel",),   # megacore / 2-TC sharding
            vmem_limit_bytes=vmem_limit,
        ),
    )(x_in, w, b)


if __name__ == "__main__":
    # Small shapes consistent with BertPooler: batch=4, seq=8, hidden=128.
    # hidden=128 keeps it tiny while exercising the fused token-0 gather path
    # (requires H % 128 == 0, as at every real BERT size).
    B, S, H = 4, 8, 128
    key = jax.random.PRNGKey(0)
    k0, k1, k2 = jax.random.split(key, 3)

    # LinearActivation(H, H, act='tanh'): torch weight is (out, in); we store
    # the transpose (in, out) so the kernel computes x @ W + b == F.linear.
    bound = 1.0 / math.sqrt(H)
    w = jax.random.uniform(k0, (H, H), jnp.float32, -bound, bound)
    b = jax.random.uniform(k1, (H,), jnp.float32, -bound, bound)
    hidden_states = jax.random.normal(k2, (B, S, H), jnp.float32)

    pooled = jax.block_until_ready(bert_pooler(hidden_states, w, b))

    ref = jnp.tanh(hidden_states[:, 0] @ w + b)
    assert pooled.shape == (B, H)
    assert jnp.allclose(pooled, ref, atol=1e-4, rtol=1e-4), float(
        jnp.max(jnp.abs(pooled - ref)))

    print("KERNEL_OK")
</pallas_src>

<mosaic_0001>
module attributes {stable_mosaic.version = 11 : i64} {
  func.func @kernel(%arg0: i32, %arg1: memref<4x128xf32, #tpu.memory_space<vmem>>, %arg2: memref<128x128xf32, #tpu.memory_space<vmem>>, %arg3: memref<1x128xf32, #tpu.memory_space<vmem>>, %arg4: memref<4x128xf32, #tpu.memory_space<vmem>>) attributes {dimension_semantics = [#tpu.dimension_semantics<parallel>], iteration_bounds = array<i64: 1>, scalar_prefetch = 0 : i64, scratch_operands = 0 : i64, tpu.core_type = #tpu.core_type<tc>, window_params = [{transform_indices = @transform_0, window_bounds = array<i64: 4, 128>}, {pipeline_mode = #tpu.pipeline_mode<synchronous>, transform_indices = @transform_1, window_bounds = array<i64: 128, 128>}, {pipeline_mode = #tpu.pipeline_mode<synchronous>, transform_indices = @transform_2, window_bounds = array<i64: 1, 128>}, {transform_indices = @transform_3, window_bounds = array<i64: 4, 128>}]} {
    %c0 = arith.constant 0 : index
    %c0_0 = arith.constant 0 : index
    %0 = vector.load %arg2[%c0, %c0_0] : memref<128x128xf32, #tpu.memory_space<vmem>>, vector<128x128xf32>
    %c0_1 = arith.constant 0 : index
    %c0_2 = arith.constant 0 : index
    %1 = vector.load %arg3[%c0_1, %c0_2] : memref<1x128xf32, #tpu.memory_space<vmem>>, vector<1x128xf32>
    %c0_3 = arith.constant 0 : index
    %c0_4 = arith.constant 0 : index
    %2 = vector.load %arg1[%c0_3, %c0_4] : memref<4x128xf32, #tpu.memory_space<vmem>>, vector<4x128xf32>
    %cst = arith.constant dense<0.000000e+00> : vector<4x128xf32>
    %3 = tpu.matmul %2, %0, %cst {dimension_numbers = #tpu.dot_dimension_numbers<[1], [0], [0], [1], [0, 0, 1, 1], [], []>} : vector<4x128xf32>, vector<128x128xf32>, vector<4x128xf32> -> vector<4x128xf32>
    %4 = vector.broadcast %1 : vector<1x128xf32> to vector<4x128xf32>
    %5 = arith.addf %3, %4 : vector<4x128xf32>
    %6 = math.tanh %5 : vector<4x128xf32>
    %c0_5 = arith.constant 0 : index
    %c0_6 = arith.constant 0 : index
    %7 = vector.load %arg4[%c0_5, %c0_6] : memref<4x128xf32, #tpu.memory_space<vmem>>, vector<4x128xf32>
    tpu.vector_store %arg4[%c0_5, %c0_6], %6 {strides = array<i32>} : memref<4x128xf32, #tpu.memory_space<vmem>>, vector<4x128xf32>,
    return
  }
  func.func @transform_0(%arg0: i32) -> (i32, i32) {
    %c0_i32 = arith.constant 0 : i32
    %c0_i32_0 = arith.constant 0 : i32
    return %arg0, %c0_i32 : i32, i32
  }
  func.func @transform_1(%arg0: i32) -> (i32, i32) {
    %c0_i32 = arith.constant 0 : i32
    %c0_i32_0 = arith.constant 0 : i32
    %c0_i32_1 = arith.constant 0 : i32
    return %c0_i32, %c0_i32_0 : i32, i32
  }
  func.func @transform_2(%arg0: i32) -> (i32, i32) {
    %c0_i32 = arith.constant 0 : i32
    %c0_i32_0 = arith.constant 0 : i32
    %c0_i32_1 = arith.constant 0 : i32
    return %c0_i32, %c0_i32_0 : i32, i32
  }
  func.func @transform_3(%arg0: i32) -> (i32, i32) {
    %c0_i32 = arith.constant 0 : i32
    %c0_i32_0 = arith.constant 0 : i32
    return %arg0, %c0_i32 : i32, i32
  }
}

</mosaic_0001>

<bundles_post_ra>
// kernel: tpu_custom_call.1
= control target key start
LH: loop header
LB: loop body
LE: loop exit
PB: predicated region body
PF: predicated region fallthrough
CT: control target
= control target key end

     0   :  { %8 = vsyncpa [#allocation3], 0  ;;  %s229_s0 = inlined_call_operand.hbm [shape: f32[4,1024], index: 0, kind: input, shape index: {}]   ;;  %s230_s1 = inlined_call_operand.hbm [shape: f32[128,128], index: 1, kind: input, shape index: {}]   ;;  %s231_s2 = inlined_call_operand.vmem [shape: f32[1,128], index: 2, kind: input, shape index: {}]   ;;  %s232_s3 = inlined_call_operand.hbm [shape: f32[4,128], index: 3, kind: output, shape index: {}]  }
   0x1   :  { %9 = vsyncpa [#allocation6], 0 }
   0x2   :  { %10 = vsyncpa [#allocation4], 0  ;;  %s16_s14 = sshll.u32 %s229_s0, 4  ;;  %s192_s15 = smov [#allocation2]   ;;  %s17_s14 = int_to_ptr.hbm [resolvable:$true] %s16_s14 }
   0x3   :  { %s18_s16 = sshll.u32 %s192_s15, 4  ;;  %s26_s19 = sshll.u32 %s230_s1, 4  ;;  %s19_s16 = int_to_ptr.vmem [resolvable:$true] %s18_s16  ;;  %s27_s19 = int_to_ptr.hbm [resolvable:$true] %s26_s19 }
   0x4   :  { %21 = dma.hbm_to_vmem [thread:$0]  %s17_s14, 64, %s19_s16, [#allocation3]  }
   0x5   :  { %s193_s20 = smov [#allocation5]   ;;  %s194_s22 = smov 128  }
   0x6   :  { %s28_s21 = sshll.u32 %s193_s20, 4  ;;  %s195_s23 = smov 8   ;;  %s29_s21 = int_to_ptr.vmem [resolvable:$true] %s28_s21 }
   0x7   :  { %34 = dma.hbm_to_vmem [thread:$0]  %s27_s19, 2048, %s29_s21, [#allocation6], %s194_s22, %s194_s22, %s195_s23  }
   0x8   :  { %186 = dma.done.wait [#allocation3], 64  }
   0x9   :  { %187 = vsyncadd [#allocation3], 4294967232 }
   0xa   :  { %188 = dma.done.wait [#allocation6], 2048  }
   0xb   :  { %189 = vsyncadd [#allocation6], 4294965248  ;;  %v60_v0 = vld [vmem:[#allocation5 + $0x78] sm:$0xff]  ;;  %v59_v1 = vld [vmem:[#allocation5 + $0x70] sm:$0xff]  ;;  %s196_s24 = smov [#allocation7]   ;;  %s95_s28 = sshll.u32 %s232_s3, 4  ;;  %s96_s28 = int_to_ptr.hbm [resolvable:$true] %s95_s28 }
   0xc   :  { %66 = vmatpush.msra.mxu0 %v60_v0  ;;  %v58_v2 = vld [vmem:[#allocation5 + $0x68] sm:$0xff]  ;;  %v57_v3 = vld [vmem:[#allocation5 + $0x60] sm:$0xff]  ;;  %v56_v4 = vld [vmem:[#allocation5 + $0x58] sm:$0xff]  ;;  %s93_s25 = sshll.u32 %s196_s24, 4  ;;  %s94_s25 = int_to_ptr.vmem [resolvable:$true] %s93_s25 }
   0xd   :  { %v55_v5 = vld [vmem:[#allocation5 + $0x50] sm:$0xff]  ;;  %v54_v6 = vld [vmem:[#allocation5 + $0x48] sm:$0xff]  ;;  %v53_v7 = vld [vmem:[#allocation5 + $0x40] sm:$0xff] }
   0xe   :  { %67 = vmatpush.msra.mxu0 %v59_v1  ;;  %v52_v8 = vld [vmem:[#allocation5 + $0x38] sm:$0xff]  ;;  %v51_v9 = vld [vmem:[#allocation5 + $0x30] sm:$0xff]  ;;  %v50_v10 = vld [vmem:[#allocation5 + $0x28] sm:$0xff] }
   0xf   :  { %v49_v11 = vld [vmem:[#allocation5 + $0x20] sm:$0xff]  ;;  %v48_v12 = vld [vmem:[#allocation5 + $0x18] sm:$0xff]  ;;  %v47_v13 = vld [vmem:[#allocation5 + $0x10] sm:$0xff] }
  0x10   :  { %68 = vmatpush.msra.mxu0 %v58_v2  ;;  %v46_v14 = vld [vmem:[#allocation5 + $0x8] sm:$0xff]  ;;  %v45_v15 = vld [vmem:[#allocation5] sm:$0xff]  ;;  %v62_v16 = vld [vmem:[#allocation2] sm:$0xf] }
  0x11   :  { %v111_v17 = vld [vmem:[%s231_s2] ss:$0 sm:$0xff] }
  0x12   :  { %69 = vmatpush.msra.mxu0 %v57_v3 }
  0x14   :  { %70 = vmatpush.msra.mxu0 %v56_v4 }
  0x16   :  { %71 = vmatpush.msra.mxu0 %v55_v5 }
  0x18   :  { %72 = vmatpush.msra.mxu0 %v54_v6 }
  0x1a   :  { %73 = vmatpush.msra.mxu0 %v53_v7 }
  0x1c   :  { %74 = vmatpush.msra.mxu0 %v52_v8 }
  0x1e   :  { %75 = vmatpush.msra.mxu0 %v51_v9 }
  0x20   :  { %76 = vmatpush.msra.mxu0 %v50_v10 }
  0x22   :  { %77 = vmatpush.msra.mxu0 %v49_v11 }
  0x24   :  { %78 = vmatpush.msra.mxu0 %v48_v12 }
  0x26   :  { %79 = vmatpush.msra.mxu0 %v47_v13 }
  0x28   :  { %80 = vmatpush.msra.mxu0 %v46_v14 }
  0x2a   :  { %81 = vmatpush.msra.mxu0 %v45_v15 }
  0x2b   :  { %82 = vmatmul.f32.vlgmr.msra.gmra.mxu0 %v62_v16 }
  0xa8   :  { %v83_v18 = vpop.f32.mrf.mxu0 }
  0xa9   :  { %v84_v19 = vadd.f32 %v111_v17, %v83_v18 }
  0xab   :  { %112 = vtanh.f32 %v84_v19 }
  0xb1   :  { %v113_v20 = vpop.eup %112 }
  0xb2   :  { %87 = vst [vmem:[#allocation7] sm:$0xf] %v113_v20 }
  0xb3   :  { %98 = dma.vmem_to_hbm [thread:$0]  %s94_s25, 64, %s96_s28, [#allocation4]  }
  0xb4   :  { %190 = dma.done.wait [#allocation4], 64  }
  0xb5   :  { %191 = vsyncadd [#allocation4], 4294967232 }
  0xb6   :  { %103 = vsyncpa [#allocation3], 1 }
  0xb7   :  { %104 = vsyncpa [#allocation6], 1 }
  0xb8   :  { %105 = vsyncpa [#allocation4], 1 }

</bundles_post_ra>
